<compile_context>
chip_gen: v5e
topology: v5e:2x2
jax: 0.10.0
libtpu: 0.0.40
codegen_flags: <defaults>
</compile_context>

<pallas_src>
import jax
import jax.numpy as jnp
from jax import lax
from jax.experimental import pallas as pl
from jax.experimental.pallas import tpu as pltpu


# ----------------------------------------------------------------------------
# Parameter preparation (one-time, outside the hot path)
# ----------------------------------------------------------------------------
def _band_weights(w_hwio, W):
    """Fold horizontal taps (dx) + zero column padding into banded matrices.

    w_hwio: (kH, kW, Cin, Cout)  ->  (kH, W*Cin, W*Cout) with
        band[dy, xi*Cin+ci, xo*Cout+co] = w[dy, xi-xo+1, ci, co] if |xi-xo|<=1
                                          else 0
    so that  out_row = sum_dy  in_row(shifted by dy) @ band[dy]
    reproduces a 3x3 'same' conv on a (H, W*C) lane-packed row layout.
    """
    kh, kw, cin, cout = w_hwio.shape
    half = (kw - 1) // 2
    xi = jnp.arange(W)[:, None]              # input column
    xo = jnp.arange(W)[None, :]              # output column
    dx = xi - xo + half                      # (W, W)
    valid = (dx >= 0) & (dx < kw)
    dxc = jnp.clip(dx, 0, kw - 1)
    wg = w_hwio[:, dxc]                      # (kh, W, W, Cin, Cout)
    wg = jnp.where(valid[None, :, :, None, None], wg, 0.0)
    return jnp.transpose(wg, (0, 1, 3, 2, 4)).reshape(kh, W * cin, W * cout)


def _batch_band(band, B):
    """(3, Ki, Ko) -> (3, B*Ki, B*Ko): block-diagonal over batch (no image mixing)."""
    k, ki, ko = band.shape
    eye = jnp.eye(B, dtype=band.dtype)
    return jnp.einsum("bc,kio->kbico", eye, band).reshape(k, B * ki, B * ko)


def prepare_params(params, B, W):
    """HWIO conv weights -> batched banded bf16 matrices + lane-tiled f32 biases."""
    w1, b1, alpha, w2, b2 = params
    wb1 = _batch_band(_band_weights(w1, W), B).astype(jnp.bfloat16)  # (3, B*W*C1, B*W*C2)
    wb2 = _batch_band(_band_weights(w2, W), B).astype(jnp.bfloat16)  # (3, B*W*C2, B*W*C1)
    b1t = jnp.tile(b1.reshape(1, -1), (1, B * W)).astype(jnp.float32)  # (1, B*W*C2)
    b2t = jnp.tile(b2.reshape(1, -1), (1, B * W)).astype(jnp.float32)  # (1, B*W*C1)
    alpha2 = jnp.asarray(alpha, jnp.float32).reshape(1, 1)             # SMEM scalar
    return wb1, b1t, alpha2, wb2, b2t


# ----------------------------------------------------------------------------
# Fused Pallas kernel: conv1 + bias + PReLU + conv2 + bias + identity skip
# ----------------------------------------------------------------------------
def _make_kernel(H):
    def kernel(x_ref, wb1_ref, b1_ref, alpha_ref, wb2_ref, b2_ref, out_ref):
        x = x_ref[...]                                   # (H, B*W*C1) f32
        rows = lax.broadcasted_iota(jnp.int32, (H, 1), 0)
        top = rows == 0
        bot = rows == H - 1

        def conv3x3(inp_bf16, w_ref):
            # Three banded matmuls (one per vertical tap); vertical zero padding
            # is realized by rolling the dy=0 / dy=2 matmul outputs one row and
            # masking the wrapped border row -- no padded copies, no scratch.
            c_mid = jnp.dot(inp_bf16, w_ref[1], preferred_element_type=jnp.float32)
            c_up = jnp.dot(inp_bf16, w_ref[0], preferred_element_type=jnp.float32)
            c_dn = jnp.dot(inp_bf16, w_ref[2], preferred_element_type=jnp.float32)
            c_up = jnp.where(top, 0.0, pltpu.roll(c_up, 1, axis=0))       # out[y] += in[y-1]@w0
            c_dn = jnp.where(bot, 0.0, pltpu.roll(c_dn, H - 1, axis=0))   # out[y] += in[y+1]@w2
            return c_mid + c_up + c_dn

        # conv1 + bias
        a1 = conv3x3(x.astype(jnp.bfloat16), wb1_ref) + b1_ref[...]
        # PReLU (single shared alpha), in f32 on the VPU
        alpha = alpha_ref[0, 0]
        act = jnp.where(a1 >= 0.0, a1, alpha * a1)       # (H, B*W*C2), stays in vregs
        # conv2 + bias
        a2 = conv3x3(act.astype(jnp.bfloat16), wb2_ref) + b2_ref[...]
        # identity skip + fully lane-dense (128) store
        out_ref[...] = a2 + x

    return kernel


def basic_forward(x_nchw, prepped):
    """Equivalent of Basic('conv-prelu(0.25)-conv+skip', [4, 8, 4]).forward."""
    wb1, b1t, alpha, wb2, b2t = prepped
    B, C1, H, W = x_nchw.shape
    K1 = B * W * C1                  # 128 for (B,C,W) = (2,4,16)
    K2 = wb1.shape[2]                # B*W*C2 = 256

    # NCHW -> (H, B*W*C1) lane-packed rows; the only wrapper-side layout glue.
    x2d = jnp.transpose(x_nchw, (2, 0, 3, 1)).reshape(H, K1).astype(jnp.float32)

    out2d = pl.pallas_call(
        _make_kernel(H),
        out_shape=jax.ShapeDtypeStruct((H, K1), jnp.float32),
        grid=(1,),                                         # whole batch in one step
        in_specs=[
            pl.BlockSpec((H, K1), lambda i: (0, 0)),                     # x
            pl.BlockSpec((3, K1, K2), lambda i: (0, 0, 0)),              # banded W1 (bf16)
            pl.BlockSpec((1, K2), lambda i: (0, 0)),                     # tiled bias1
            pl.BlockSpec((1, 1), lambda i: (0, 0),
                         memory_space=pltpu.MemorySpace.SMEM),           # PReLU alpha
            pl.BlockSpec((3, K2, K1), lambda i: (0, 0, 0)),              # banded W2 (bf16)
            pl.BlockSpec((1, K1), lambda i: (0, 0)),                     # tiled bias2
        ],
        out_specs=pl.BlockSpec((H, K1), lambda i: (0, 0)),
        compiler_params=pltpu.CompilerParams(
            dimension_semantics=("arbitrary",)),
    )(x2d, wb1, b1t, alpha, wb2, b2t)

    out = out2d.reshape(H, B, W, C1)
    return jnp.transpose(out, (1, 3, 0, 2))                # back to NCHW


# ----------------------------------------------------------------------------
# Pure-JAX reference (lax.conv) for verification only
# ----------------------------------------------------------------------------
def _reference_forward(x_nchw, params):
    w1, b1, alpha, w2, b2 = params
    x = jnp.transpose(x_nchw, (0, 2, 3, 1)).astype(jnp.float32)
    dn = ("NHWC", "HWIO", "NHWC")
    y = lax.conv_general_dilated(x, w1, (1, 1), "SAME", dimension_numbers=dn)
    y = y + b1.reshape(1, 1, 1, -1)
    y = jnp.where(y >= 0.0, y, alpha * y)
    z = lax.conv_general_dilated(y, w2, (1, 1), "SAME", dimension_numbers=dn)
    z = z + b2.reshape(1, 1, 1, -1)
    z = z + x
    return jnp.transpose(z, (0, 3, 1, 2))


def init_params(key, c_in=4, c_mid=8):
    """Deterministic init mimicking torch Conv2d defaults (uniform +/- 1/sqrt(fan_in))."""
    k1, k2, k3, k4 = jax.random.split(key, 4)
    b1_bound = float(1.0 / (c_in * 9) ** 0.5)
    b2_bound = float(1.0 / (c_mid * 9) ** 0.5)
    # weights stored HWIO: (kH, kW, Cin, Cout)
    w1 = jax.random.uniform(k1, (3, 3, c_in, c_mid), jnp.float32, -b1_bound, b1_bound)
    b1 = jax.random.uniform(k2, (c_mid,), jnp.float32, -b1_bound, b1_bound)
    w2 = jax.random.uniform(k3, (3, 3, c_mid, c_in), jnp.float32, -b2_bound, b2_bound)
    b2 = jax.random.uniform(k4, (c_in,), jnp.float32, -b2_bound, b2_bound)
    alpha = jnp.array([0.25], dtype=jnp.float32)   # PReLU(num_parameters=1, init=0.25)
    return (w1, b1, alpha, w2, b2)


if __name__ == "__main__":
    key = jax.random.PRNGKey(0)
    k_x, k_p = jax.random.split(key)

    B, C, H, W = 2, 4, 16, 16                      # NCHW input, intChans = [4, 8, 4]
    x = jax.random.normal(k_x, (B, C, H, W), dtype=jnp.float32)
    params = init_params(k_p, c_in=C, c_mid=8)

    prepped = prepare_params(params, B, W)         # one-time banding / tiling / bf16 cast
    fwd = jax.jit(basic_forward)

    out = jax.block_until_ready(fwd(x, prepped))
    ref = jax.block_until_ready(_reference_forward(x, params))

    assert out.shape == (B, C, H, W)
    # Tolerance reflects bf16 MXU operands (f32 accumulation); f32 elementwise path.
    assert jnp.allclose(out, ref, rtol=2e-2, atol=2e-2), (
        f"mismatch vs reference, max abs err = {float(jnp.max(jnp.abs(out - ref)))}")

    print("KERNEL_OK")
</pallas_src>

<mosaic_0001>
module attributes {stable_mosaic.version = 11 : i64} {
  func.func @kernel(%arg0: i32, %arg1: memref<16x128xf32, #tpu.memory_space<vmem>>, %arg2: memref<3x128x256xbf16, #tpu.memory_space<vmem>>, %arg3: memref<1x256xf32, #tpu.memory_space<vmem>>, %arg4: memref<1x1xf32, #tpu.memory_space<smem>>, %arg5: memref<3x256x128xbf16, #tpu.memory_space<vmem>>, %arg6: memref<1x128xf32, #tpu.memory_space<vmem>>, %arg7: memref<16x128xf32, #tpu.memory_space<vmem>>) attributes {dimension_semantics = [#tpu.dimension_semantics<arbitrary>], iteration_bounds = array<i64: 1>, scalar_prefetch = 0 : i64, scratch_operands = 0 : i64, tpu.core_type = #tpu.core_type<tc>, window_params = [{pipeline_mode = #tpu.pipeline_mode<synchronous>, transform_indices = @transform_0, window_bounds = array<i64: 16, 128>}, {pipeline_mode = #tpu.pipeline_mode<synchronous>, transform_indices = @transform_1, window_bounds = array<i64: 3, 128, 256>}, {pipeline_mode = #tpu.pipeline_mode<synchronous>, transform_indices = @transform_2, window_bounds = array<i64: 1, 256>}, {transform_indices = @transform_3, window_bounds = array<i64: 1, 1>}, {pipeline_mode = #tpu.pipeline_mode<synchronous>, transform_indices = @transform_4, window_bounds = array<i64: 3, 256, 128>}, {pipeline_mode = #tpu.pipeline_mode<synchronous>, transform_indices = @transform_5, window_bounds = array<i64: 1, 128>}, {pipeline_mode = #tpu.pipeline_mode<synchronous>, transform_indices = @transform_6, window_bounds = array<i64: 16, 128>}]} {
    %c0 = arith.constant 0 : index
    %c0_0 = arith.constant 0 : index
    %0 = vector.load %arg1[%c0, %c0_0] : memref<16x128xf32, #tpu.memory_space<vmem>>, vector<16x128xf32>
    %1 = tpu.iota {dimensions = array<i32: 0>} : vector<16x1xi32>
    %c0_i32 = arith.constant 0 : i32
    %2 = vector.broadcast %c0_i32 : i32 to vector<16x1xi32>
    %3 = arith.cmpi eq, %1, %2 : vector<16x1xi32>
    %c15_i32 = arith.constant 15 : i32
    %4 = vector.broadcast %c15_i32 : i32 to vector<16x1xi32>
    %5 = arith.cmpi eq, %1, %4 : vector<16x1xi32>
    %6 = arith.truncf %0 : vector<16x128xf32> to vector<16x128xbf16>
    %c1 = arith.constant 1 : index
    %c0_1 = arith.constant 0 : index
    %c0_2 = arith.constant 0 : index
    %7 = vector.load %arg2[%c1, %c0_1, %c0_2] : memref<3x128x256xbf16, #tpu.memory_space<vmem>>, vector<1x128x256xbf16>
    %8 = vector.shape_cast %7 : vector<1x128x256xbf16> to vector<128x256xbf16>
    %cst = arith.constant dense<0.000000e+00> : vector<16x256xf32>
    %9 = tpu.matmul %6, %8, %cst {dimension_numbers = #tpu.dot_dimension_numbers<[1], [0], [0], [1], [0, 0, 1, 1], [], []>} : vector<16x128xbf16>, vector<128x256xbf16>, vector<16x256xf32> -> vector<16x256xf32>
    %c0_3 = arith.constant 0 : index
    %c0_4 = arith.constant 0 : index
    %c0_5 = arith.constant 0 : index
    %10 = vector.load %arg2[%c0_3, %c0_4, %c0_5] : memref<3x128x256xbf16, #tpu.memory_space<vmem>>, vector<1x128x256xbf16>
    %11 = vector.shape_cast %10 : vector<1x128x256xbf16> to vector<128x256xbf16>
    %cst_6 = arith.constant dense<0.000000e+00> : vector<16x256xf32>
    %12 = tpu.matmul %6, %11, %cst_6 {dimension_numbers = #tpu.dot_dimension_numbers<[1], [0], [0], [1], [0, 0, 1, 1], [], []>} : vector<16x128xbf16>, vector<128x256xbf16>, vector<16x256xf32> -> vector<16x256xf32>
    %c2 = arith.constant 2 : index
    %c0_7 = arith.constant 0 : index
    %c0_8 = arith.constant 0 : index
    %13 = vector.load %arg2[%c2, %c0_7, %c0_8] : memref<3x128x256xbf16, #tpu.memory_space<vmem>>, vector<1x128x256xbf16>
    %14 = vector.shape_cast %13 : vector<1x128x256xbf16> to vector<128x256xbf16>
    %cst_9 = arith.constant dense<0.000000e+00> : vector<16x256xf32>
    %15 = tpu.matmul %6, %14, %cst_9 {dimension_numbers = #tpu.dot_dimension_numbers<[1], [0], [0], [1], [0, 0, 1, 1], [], []>} : vector<16x128xbf16>, vector<128x256xbf16>, vector<16x256xf32> -> vector<16x256xf32>
    %c1_i32 = arith.constant 1 : i32
    %16 = tpu.dynamic_rotate %12 by %c1_i32 dim 0 : vector<16x256xf32>, i32 -> vector<16x256xf32>
    %cst_10 = arith.constant 0.000000e+00 : f32
    %17 = vector.shape_cast %3 : vector<16x1xi1> to vector<16x1xi1>
    %18 = vector.broadcast %17 : vector<16x1xi1> to vector<16x256xi1>
    %19 = vector.broadcast %cst_10 : f32 to vector<16x256xf32>
    %20 = arith.select %18, %19, %16 : vector<16x256xi1>, vector<16x256xf32>
    %c15_i32_11 = arith.constant 15 : i32
    %21 = tpu.dynamic_rotate %15 by %c15_i32_11 dim 0 : vector<16x256xf32>, i32 -> vector<16x256xf32>
    %cst_12 = arith.constant 0.000000e+00 : f32
    %22 = vector.shape_cast %5 : vector<16x1xi1> to vector<16x1xi1>
    %23 = vector.broadcast %22 : vector<16x1xi1> to vector<16x256xi1>
    %24 = vector.broadcast %cst_12 : f32 to vector<16x256xf32>
    %25 = arith.select %23, %24, %21 : vector<16x256xi1>, vector<16x256xf32>
    %26 = arith.addf %9, %20 : vector<16x256xf32>
    %27 = arith.addf %26, %25 : vector<16x256xf32>
    %c0_13 = arith.constant 0 : index
    %c0_14 = arith.constant 0 : index
    %28 = vector.load %arg3[%c0_13, %c0_14] : memref<1x256xf32, #tpu.memory_space<vmem>>, vector<1x256xf32>
    %29 = vector.broadcast %28 : vector<1x256xf32> to vector<16x256xf32>
    %30 = arith.addf %27, %29 : vector<16x256xf32>
    %c0_15 = arith.constant 0 : index
    %c0_16 = arith.constant 0 : index
    %31 = memref.load %arg4[%c0_15, %c0_16] : memref<1x1xf32, #tpu.memory_space<smem>>
    %cst_17 = arith.constant 0.000000e+00 : f32
    %32 = vector.broadcast %cst_17 : f32 to vector<16x256xf32>
    %33 = arith.cmpf oge, %30, %32 : vector<16x256xf32>
    %34 = vector.broadcast %31 : f32 to vector<16x256xf32>
    %35 = arith.mulf %34, %30 : vector<16x256xf32>
    %36 = arith.select %33, %30, %35 : vector<16x256xi1>, vector<16x256xf32>
    %37 = arith.truncf %36 : vector<16x256xf32> to vector<16x256xbf16>
    %c1_18 = arith.constant 1 : index
    %c0_19 = arith.constant 0 : index
    %c0_20 = arith.constant 0 : index
    %38 = vector.load %arg5[%c1_18, %c0_19, %c0_20] : memref<3x256x128xbf16, #tpu.memory_space<vmem>>, vector<1x256x128xbf16>
    %39 = vector.shape_cast %38 : vector<1x256x128xbf16> to vector<256x128xbf16>
    %cst_21 = arith.constant dense<0.000000e+00> : vector<16x128xf32>
    %40 = tpu.matmul %37, %39, %cst_21 {dimension_numbers = #tpu.dot_dimension_numbers<[1], [0], [0], [1], [0, 0, 1, 1], [], []>} : vector<16x256xbf16>, vector<256x128xbf16>, vector<16x128xf32> -> vector<16x128xf32>
    %c0_22 = arith.constant 0 : index
    %c0_23 = arith.constant 0 : index
    %c0_24 = arith.constant 0 : index
    %41 = vector.load %arg5[%c0_22, %c0_23, %c0_24] : memref<3x256x128xbf16, #tpu.memory_space<vmem>>, vector<1x256x128xbf16>
    %42 = vector.shape_cast %41 : vector<1x256x128xbf16> to vector<256x128xbf16>
    %cst_25 = arith.constant dense<0.000000e+00> : vector<16x128xf32>
    %43 = tpu.matmul %37, %42, %cst_25 {dimension_numbers = #tpu.dot_dimension_numbers<[1], [0], [0], [1], [0, 0, 1, 1], [], []>} : vector<16x256xbf16>, vector<256x128xbf16>, vector<16x128xf32> -> vector<16x128xf32>
    %c2_26 = arith.constant 2 : index
    %c0_27 = arith.constant 0 : index
    %c0_28 = arith.constant 0 : index
    %44 = vector.load %arg5[%c2_26, %c0_27, %c0_28] : memref<3x256x128xbf16, #tpu.memory_space<vmem>>, vector<1x256x128xbf16>
    %45 = vector.shape_cast %44 : vector<1x256x128xbf16> to vector<256x128xbf16>
    %cst_29 = arith.constant dense<0.000000e+00> : vector<16x128xf32>
    %46 = tpu.matmul %37, %45, %cst_29 {dimension_numbers = #tpu.dot_dimension_numbers<[1], [0], [0], [1], [0, 0, 1, 1], [], []>} : vector<16x256xbf16>, vector<256x128xbf16>, vector<16x128xf32> -> vector<16x128xf32>
    %c1_i32_30 = arith.constant 1 : i32
    %47 = tpu.dynamic_rotate %43 by %c1_i32_30 dim 0 : vector<16x128xf32>, i32 -> vector<16x128xf32>
    %cst_31 = arith.constant 0.000000e+00 : f32
    %48 = vector.shape_cast %3 : vector<16x1xi1> to vector<16x1xi1>
    %49 = vector.broadcast %48 : vector<16x1xi1> to vector<16x128xi1>
    %50 = vector.broadcast %cst_31 : f32 to vector<16x128xf32>
    %51 = arith.select %49, %50, %47 : vector<16x128xi1>, vector<16x128xf32>
    %c15_i32_32 = arith.constant 15 : i32
    %52 = tpu.dynamic_rotate %46 by %c15_i32_32 dim 0 : vector<16x128xf32>, i32 -> vector<16x128xf32>
    %cst_33 = arith.constant 0.000000e+00 : f32
    %53 = vector.shape_cast %5 : vector<16x1xi1> to vector<16x1xi1>
    %54 = vector.broadcast %53 : vector<16x1xi1> to vector<16x128xi1>
    %55 = vector.broadcast %cst_33 : f32 to vector<16x128xf32>
    %56 = arith.select %54, %55, %52 : vector<16x128xi1>, vector<16x128xf32>
    %57 = arith.addf %40, %51 : vector<16x128xf32>
    %58 = arith.addf %57, %56 : vector<16x128xf32>
    %c0_34 = arith.constant 0 : index
    %c0_35 = arith.constant 0 : index
    %59 = vector.load %arg6[%c0_34, %c0_35] : memref<1x128xf32, #tpu.memory_space<vmem>>, vector<1x128xf32>
    %60 = vector.broadcast %59 : vector<1x128xf32> to vector<16x128xf32>
    %61 = arith.addf %58, %60 : vector<16x128xf32>
    %62 = arith.addf %61, %0 : vector<16x128xf32>
    %c0_36 = arith.constant 0 : index
    %c0_37 = arith.constant 0 : index
    %63 = vector.load %arg7[%c0_36, %c0_37] : memref<16x128xf32, #tpu.memory_space<vmem>>, vector<16x128xf32>
    tpu.vector_store %arg7[%c0_36, %c0_37], %62 {strides = array<i32>} : memref<16x128xf32, #tpu.memory_space<vmem>>, vector<16x128xf32>,
    return
  }
  func.func @transform_0(%arg0: i32) -> (i32, i32) {
    %c0_i32 = arith.constant 0 : i32
    %c0_i32_0 = arith.constant 0 : i32
    %c0_i32_1 = arith.constant 0 : i32
    return %c0_i32, %c0_i32_0 : i32, i32
  }
  func.func @transform_1(%arg0: i32) -> (i32, i32, i32) {
    %c0_i32 = arith.constant 0 : i32
    %c0_i32_0 = arith.constant 0 : i32
    %c0_i32_1 = arith.constant 0 : i32
    %c0_i32_2 = arith.constant 0 : i32
    return %c0_i32, %c0_i32_0, %c0_i32_1 : i32, i32, i32
  }
  func.func @transform_2(%arg0: i32) -> (i32, i32) {
    %c0_i32 = arith.constant 0 : i32
    %c0_i32_0 = arith.constant 0 : i32
    %c0_i32_1 = arith.constant 0 : i32
    return %c0_i32, %c0_i32_0 : i32, i32
  }
  func.func @transform_3(%arg0: i32) -> (i32, i32) {
    %c0_i32 = arith.constant 0 : i32
    %c0_i32_0 = arith.constant 0 : i32
    %c0_i32_1 = arith.constant 0 : i32
    return %c0_i32, %c0_i32_0 : i32, i32
  }
  func.func @transform_4(%arg0: i32) -> (i32, i32, i32) {
    %c0_i32 = arith.constant 0 : i32
    %c0_i32_0 = arith.constant 0 : i32
    %c0_i32_1 = arith.constant 0 : i32
    %c0_i32_2 = arith.constant 0 : i32
    return %c0_i32, %c0_i32_0, %c0_i32_1 : i32, i32, i32
  }
  func.func @transform_5(%arg0: i32) -> (i32, i32) {
    %c0_i32 = arith.constant 0 : i32
    %c0_i32_0 = arith.constant 0 : i32
    %c0_i32_1 = arith.constant 0 : i32
    return %c0_i32, %c0_i32_0 : i32, i32
  }
  func.func @transform_6(%arg0: i32) -> (i32, i32) {
    %c0_i32 = arith.constant 0 : i32
    %c0_i32_0 = arith.constant 0 : i32
    %c0_i32_1 = arith.constant 0 : i32
    return %c0_i32, %c0_i32_0 : i32, i32
  }
}

</mosaic_0001>

<bundles_post_ra>
// kernel: basic_forward.1
= control target key start
LH: loop header
LB: loop body
LE: loop exit
PB: predicated region body
PF: predicated region fallthrough
CT: control target
= control target key end

     0   :  { %12 = vsyncpa [#allocation4], 0  ;;  %s1529_s24 = smov [#allocation3]   ;;  %s1530_s26 = smov 64   ;;  %s1946_s0 = inlined_call_operand.vmem [shape: f32[16,128], index: 0, kind: input, shape index: {}]   ;;  %s1947_s1 = inlined_call_operand.vmem [shape: bf16[3,128,256], index: 1, kind: input, shape index: {}]   ;;  %s1948_s2 = inlined_call_operand.vmem [shape: f32[1,256], index: 2, kind: input, shape index: {}]   ;;  %s1949_s3 = inlined_call_operand.<no memory space> [shape: f32[1,1], index: 3, kind: input, shape index: {}]   ;;  %s1950_s4 = inlined_call_operand.hbm [shape: bf16[3,256,128], index: 4, kind: input, shape index: {}]   ;;  %s1951_s5 = inlined_call_operand.vmem [shape: f32[1,128], index: 5, kind: input, shape index: {}]   ;;  %s1952_s6 = inlined_call_operand.vmem [shape: f32[16,128], index: 6, kind: output, shape index: {}]  }
   0x1   :  { %s25_s23 = sshll.u32 %s1950_s4, 4  ;;  %s27_s25 = sshll.u32 %s1529_s24, 4  ;;  %s26_s23 = int_to_ptr.hbm [resolvable:$true] %s25_s23  ;;  %s28_s25 = int_to_ptr.vmem [resolvable:$true] %s27_s25 }
   0x2   :  { %s1531_s27 = smov 4  }
   0x3   :  { %33 = dma.hbm_to_vmem [thread:$0]  %s26_s23, 6144, %s28_s25, [#allocation4], %s1530_s26, %s1530_s26, %s1531_s27  }
   0x4   :  { %1527 = dma.done.wait [#allocation4], 6144  }
   0x5   :  { %1528 = vsyncadd [#allocation4], 4294961152  ;;  %v1061_v0 = vld [vmem:[%s1947_s1 + $0x70] sm:$0xf]  ;;  %v1434_v1 = vld [vmem:[%s1947_s1 + $0x74] sm:$0xf0] }
   0x6   :  { %v1433_v2 = vld [vmem:[%s1947_s1 + $0x74] sm:$0xf]  ;;  %v1062_v3 = vor.u32 %v1434_v1, %v1061_v0  ;;  %v1063_v4 = vld [vmem:[%s1947_s1 + $0x78] sm:$0xf0]  ;;  %v1053_v5 = vld [vmem:[%s1947_s1 + $0x60] sm:$0xf] }
   0x7   :  { %v1432_v6 = vld [vmem:[%s1947_s1 + $0x64] sm:$0xf0]  ;;  %v1066_v7 = vor.u32 %v1433_v2, %v1063_v4  ;;  %v1431_v8 = vld [vmem:[%s1947_s1 + $0x64] sm:$0xf]  ;;  %v1055_v9 = vld [vmem:[%s1947_s1 + $0x68] sm:$0xf0] }
   0x8   :  { %163 = vmatpush.bf16.msra.mxu0 %v1062_v3  ;;  %v1054_v10 = vor.u32 %v1432_v6, %v1053_v5  ;;  %v1058_v11 = vor.u32 %v1431_v8, %v1055_v9  ;;  %v1045_v12 = vld [vmem:[%s1947_s1 + $0x50] sm:$0xf]  ;;  %v1430_v13 = vld [vmem:[%s1947_s1 + $0x54] sm:$0xf0]  ;;  %v1429_v14 = vld [vmem:[%s1947_s1 + $0x54] sm:$0xf] }
   0x9   :  { %177 = vmatpush.bf16.msra.mxu1 %v1066_v7  ;;  %v1047_v15 = vld [vmem:[%s1947_s1 + $0x58] sm:$0xf0]  ;;  %v1141_v16 = vld [vmem:[%s1947_s1 + $0x170] sm:$0xf]  ;;  %v1450_v17 = vld [vmem:[%s1947_s1 + $0x174] sm:$0xf0]  ;;  %v1046_v21 = vor.u32 %v1430_v13, %v1045_v12 }
   0xa   :  { %v1142_v18 = vor.u32 %v1450_v17, %v1141_v16  ;;  %v1449_v19 = vld [vmem:[%s1947_s1 + $0x174] sm:$0xf]  ;;  %v1143_v20 = vld [vmem:[%s1947_s1 + $0x178] sm:$0xf0]  ;;  %v1037_v22 = vld [vmem:[%s1947_s1 + $0x40] sm:$0xf]  ;;  %v1050_v25 = vor.u32 %v1429_v14, %v1047_v15 }
   0xb   :  { %v1428_v23 = vld [vmem:[%s1947_s1 + $0x44] sm:$0xf0]  ;;  %v1146_v24 = vor.u32 %v1449_v19, %v1143_v20  ;;  %v1133_v26 = vld [vmem:[%s1947_s1 + $0x160] sm:$0xf]  ;;  %v1447_v28 = vld [vmem:[%s1947_s1 + $0x164] sm:$0xf] }
   0xc   :  { %164 = vmatpush.bf16.msra.mxu0 %v1054_v10  ;;  %288 = vmatpush.bf16.msra.mxu2 %v1142_v18  ;;  %v1448_v27 = vld [vmem:[%s1947_s1 + $0x164] sm:$0xf0]  ;;  %v1427_v29 = vld [vmem:[%s1947_s1 + $0x44] sm:$0xf]  ;;  %v1039_v30 = vld [vmem:[%s1947_s1 + $0x48] sm:$0xf0]  ;;  %v1038_v35 = vor.u32 %v1428_v23, %v1037_v22 }
   0xd   :  { %178 = vmatpush.bf16.msra.mxu1 %v1058_v11  ;;  %302 = vmatpush.bf16.msra.mxu3 %v1146_v24  ;;  %v1134_v31 = vor.u32 %v1448_v27, %v1133_v26  ;;  %v1135_v32 = vld [vmem:[%s1947_s1 + $0x168] sm:$0xf0]  ;;  %v1125_v34 = vld [vmem:[%s1947_s1 + $0x150] sm:$0xf]  ;;  %v1446_v36 = vld [vmem:[%s1947_s1 + $0x154] sm:$0xf0]  ;;  %v1042_v39 = vor.u32 %v1427_v29, %v1039_v30 }
   0xe   :  { %v1138_v33 = vor.u32 %v1447_v28, %v1135_v32  ;;  %v1445_v37 = vld [vmem:[%s1947_s1 + $0x154] sm:$0xf]  ;;  %v1127_v38 = vld [vmem:[%s1947_s1 + $0x158] sm:$0xf0]  ;;  %v1029_v40 = vld [vmem:[%s1947_s1 + $0x30] sm:$0xf]  ;;  %v1126_v43 = vor.u32 %v1446_v36, %v1125_v34 }
   0xf   :  { %v1426_v41 = vld [vmem:[%s1947_s1 + $0x34] sm:$0xf0]  ;;  %v1425_v42 = vld [vmem:[%s1947_s1 + $0x34] sm:$0xf]  ;;  %v1031_v44 = vld [vmem:[%s1947_s1 + $0x38] sm:$0xf0]  ;;  %v1130_v45 = vor.u32 %v1445_v37, %v1127_v38 }
  0x10   :  { %165 = vmatpush.bf16.msra.mxu0 %v1046_v21  ;;  %289 = vmatpush.bf16.msra.mxu2 %v1134_v31  ;;  %v1117_v46 = vld [vmem:[%s1947_s1 + $0x140] sm:$0xf]  ;;  %v1444_v47 = vld [vmem:[%s1947_s1 + $0x144] sm:$0xf0]  ;;  %v1443_v48 = vld [vmem:[%s1947_s1 + $0x144] sm:$0xf]  ;;  %v1030_v50 = vor.u32 %v1426_v41, %v1029_v40  ;;  %v1034_v51 = vor.u32 %v1425_v42, %v1031_v44 }
  0x11   :  { %179 = vmatpush.bf16.msra.mxu1 %v1050_v25  ;;  %303 = vmatpush.bf16.msra.mxu3 %v1138_v33  ;;  %v1119_v49 = vld [vmem:[%s1947_s1 + $0x148] sm:$0xf0]  ;;  %v1021_v52 = vld [vmem:[%s1947_s1 + $0x20] sm:$0xf]  ;;  %v1424_v53 = vld [vmem:[%s1947_s1 + $0x24] sm:$0xf0]  ;;  %v1118_v55 = vor.u32 %v1444_v47, %v1117_v46 }
  0x12   :  { %v1423_v54 = vld [vmem:[%s1947_s1 + $0x24] sm:$0xf]  ;;  %v1023_v56 = vld [vmem:[%s1947_s1 + $0x28] sm:$0xf0]  ;;  %v1122_v57 = vor.u32 %v1443_v48, %v1119_v49  ;;  %v1109_v58 = vld [vmem:[%s1947_s1 + $0x130] sm:$0xf]  ;;  %v1022_v62 = vor.u32 %v1424_v53, %v1021_v52 }
  0x13   :  { %v1442_v59 = vld [vmem:[%s1947_s1 + $0x134] sm:$0xf0]  ;;  %v1441_v60 = vld [vmem:[%s1947_s1 + $0x134] sm:$0xf]  ;;  %v1111_v61 = vld [vmem:[%s1947_s1 + $0x138] sm:$0xf0]  ;;  %v1026_v63 = vor.u32 %v1423_v54, %v1023_v56 }
  0x14   :  { %166 = vmatpush.bf16.msra.mxu0 %v1038_v35  ;;  %290 = vmatpush.bf16.msra.mxu2 %v1126_v43  ;;  %v1013_v0 = vld [vmem:[%s1947_s1 + $0x10] sm:$0xf]  ;;  %v1422_v1 = vld [vmem:[%s1947_s1 + $0x14] sm:$0xf0]  ;;  %v1421_v2 = vld [vmem:[%s1947_s1 + $0x14] sm:$0xf]  ;;  %v1110_v3 = vor.u32 %v1442_v59, %v1109_v58  ;;  %v1114_v5 = vor.u32 %v1441_v60, %v1111_v61 }
  0x15   :  { %180 = vmatpush.bf16.msra.mxu1 %v1042_v39  ;;  %304 = vmatpush.bf16.msra.mxu3 %v1130_v45  ;;  %v1015_v4 = vld [vmem:[%s1947_s1 + $0x18] sm:$0xf0]  ;;  %v1101_v6 = vld [vmem:[%s1947_s1 + $0x120] sm:$0xf]  ;;  %v1440_v7 = vld [vmem:[%s1947_s1 + $0x124] sm:$0xf0]  ;;  %v1014_v10 = vor.u32 %v1422_v1, %v1013_v0 }
  0x16   :  { %v1439_v8 = vld [vmem:[%s1947_s1 + $0x124] sm:$0xf]  ;;  %v1103_v9 = vld [vmem:[%s1947_s1 + $0x128] sm:$0xf0]  ;;  %v1005_v11 = vld [vmem:[%s1947_s1] sm:$0xf]  ;;  %v1018_v13 = vor.u32 %v1421_v2, %v1015_v4  ;;  %v1102_v17 = vor.u32 %v1440_v7, %v1101_v6 }
  0x17   :  { %v1420_v12 = vld [vmem:[%s1947_s1 + $0x4] sm:$0xf0]  ;;  %v1419_v14 = vld [vmem:[%s1947_s1 + $0x4] sm:$0xf]  ;;  %v1007_v15 = vld [vmem:[%s1947_s1 + $0x8] sm:$0xf0]  ;;  %v1106_v21 = vor.u32 %v1439_v8, %v1103_v9 }
  0x18   :  { %167 = vmatpush.bf16.msra.mxu0 %v1030_v50  ;;  %291 = vmatpush.bf16.msra.mxu2 %v1118_v55  ;;  %v1205_v16 = vld [vmem:[%s1947_s1 + $0xf0] sm:$0xf]  ;;  %v1418_v18 = vld [vmem:[%s1947_s1 + $0xf4] sm:$0xf0]  ;;  %v1417_v19 = vld [vmem:[%s1947_s1 + $0xf4] sm:$0xf]  ;;  %v1006_v25 = vor.u32 %v1420_v12, %v1005_v11  ;;  %v1010_v29 = vor.u32 %v1419_v14, %v1007_v15 }
  0x19   :  { %181 = vmatpush.bf16.msra.mxu1 %v1034_v51  ;;  %305 = vmatpush.bf16.msra.mxu3 %v1122_v57  ;;  %v1207_v20 = vld [vmem:[%s1947_s1 + $0xf8] sm:$0xf0]  ;;  %v1753_v22 = vld [vmem:[%s1946_s0] sm:$0xff]  ;;  %v1093_v23 = vld [vmem:[%s1947_s1 + $0x110] sm:$0xf]  ;;  %v1206_v30 = vor.u32 %v1418_v18, %v1205_v16 }
  0x1a   :  { %v1438_v24 = vld [vmem:[%s1947_s1 + $0x114] sm:$0xf0]  ;;  %v1764_v26 = vld [vmem:[%s1946_s0 + $0x8] sm:$0xff]  ;;  %v1437_v27 = vld [vmem:[%s1947_s1 + $0x114] sm:$0xf]  ;;  %v1210_v31 = vor.u32 %v1417_v19, %v1207_v20 }
  0x1b   :  { %v1095_v28 = vld [vmem:[%s1947_s1 + $0x118] sm:$0xf0]  ;;  %v1197_v32 = vld [vmem:[%s1947_s1 + $0xe0] sm:$0xf]  ;;  %v1416_v33 = vld [vmem:[%s1947_s1 + $0xe4] sm:$0xf0]  ;;  %v1094_v35 = vor.u32 %v1438_v24, %v1093_v23  ;;  %v1786_v37 = vpack.c.bf16 %v1764_v26, %v1753_v22 }
  0x1c   :  { %168 = vmatpush.bf16.msra.mxu0 %v1022_v62  ;;  %292 = vmatpush.bf16.msra.mxu2 %v1110_v3  ;;  %v1415_v34 = vld [vmem:[%s1947_s1 + $0xe4] sm:$0xf]  ;;  %v1199_v36 = vld [vmem:[%s1947_s1 + $0xe8] sm:$0xf0]  ;;  %v1098_v38 = vor.u32 %v1437_v27, %v1095_v28  ;;  %v1085_v39 = vld [vmem:[%s1947_s1 + $0x100] sm:$0xf]  ;;  %v1198_v43 = vor.u32 %v1416_v33, %v1197_v32 }
  0x1d   :  { %182 = vmatpush.bf16.msra.mxu1 %v1026_v63  ;;  %306 = vmatpush.bf16.msra.mxu3 %v1114_v5  ;;  %v1436_v40 = vld [vmem:[%s1947_s1 + $0x104] sm:$0xf0]  ;;  %v1435_v41 = vld [vmem:[%s1947_s1 + $0x104] sm:$0xf]  ;;  %v1087_v42 = vld [vmem:[%s1947_s1 + $0x108] sm:$0xf0]  ;;  %v1202_v44 = vor.u32 %v1415_v34, %v1199_v36 }
  0x1e   :  { %v1189_v45 = vld [vmem:[%s1947_s1 + $0xd0] sm:$0xf]  ;;  %v1414_v46 = vld [vmem:[%s1947_s1 + $0xd4] sm:$0xf0]  ;;  %v1086_v47 = vor.u32 %v1436_v40, %v1085_v39  ;;  %v1413_v48 = vld [vmem:[%s1947_s1 + $0xd4] sm:$0xf]  ;;  %v1090_v50 = vor.u32 %v1435_v41, %v1087_v42 }
  0x1f   :  { %v1191_v49 = vld [vmem:[%s1947_s1 + $0xd8] sm:$0xf0]  ;;  %v1190_v51 = vor.u32 %v1414_v46, %v1189_v45  ;;  %v1181_v53 = vld [vmem:[%s1947_s1 + $0xc0] sm:$0xf]  ;;  %v1412_v54 = vld [vmem:[%s1947_s1 + $0xc4] sm:$0xf0] }
  0x20   :  { %169 = vmatpush.bf16.msra.mxu0 %v1014_v10  ;;  %293 = vmatpush.bf16.msra.mxu2 %v1102_v17  ;;  %v1194_v52 = vor.u32 %v1413_v48, %v1191_v49  ;;  %v1411_v55 = vld [vmem:[%s1947_s1 + $0xc4] sm:$0xf]  ;;  %v1183_v56 = vld [vmem:[%s1947_s1 + $0xc8] sm:$0xf0]  ;;  %v1182_v57 = vor.u32 %v1412_v54, %v1181_v53  ;;  %v1173_v59 = vld [vmem:[%s1947_s1 + $0xb0] sm:$0xf] }
  0x21   :  { %183 = vmatpush.bf16.msra.mxu1 %v1018_v13  ;;  %307 = vmatpush.bf16.msra.mxu3 %v1106_v21  ;;  %v1186_v58 = vor.u32 %v1411_v55, %v1183_v56  ;;  %v1410_v60 = vld [vmem:[%s1947_s1 + $0xb4] sm:$0xf0]  ;;  %v1409_v61 = vld [vmem:[%s1947_s1 + $0xb4] sm:$0xf]  ;;  %v1175_v62 = vld [vmem:[%s1947_s1 + $0xb8] sm:$0xf0] }
  0x22   :  { %v1174_v63 = vor.u32 %v1410_v60, %v1173_v59  ;;  %v1178_v0 = vor.u32 %v1409_v61, %v1175_v62  ;;  %v1165_v1 = vld [vmem:[%s1947_s1 + $0xa0] sm:$0xf]  ;;  %v1408_v2 = vld [vmem:[%s1947_s1 + $0xa4] sm:$0xf0]  ;;  %v1407_v3 = vld [vmem:[%s1947_s1 + $0xa4] sm:$0xf] }
  0x23   :  { %v1167_v4 = vld [vmem:[%s1947_s1 + $0xa8] sm:$0xf0]  ;;  %v1166_v5 = vor.u32 %v1408_v2, %v1165_v1  ;;  %v1157_v7 = vld [vmem:[%s1947_s1 + $0x90] sm:$0xf]  ;;  %v1406_v8 = vld [vmem:[%s1947_s1 + $0x94] sm:$0xf0]  ;;  %v42_v1 = vlaneseq }
  0x24   :  { %170 = vmatpush.bf16.msra.mxu0 %v1006_v25  ;;  %294 = vmatpush.bf16.msra.mxu2 %v1094_v35  ;;  %v1170_v6 = vor.u32 %v1407_v3, %v1167_v4  ;;  %v1405_v9 = vld [vmem:[%s1947_s1 + $0x94] sm:$0xf]  ;;  %v1159_v10 = vld [vmem:[%s1947_s1 + $0x98] sm:$0xf0]  ;;  %v1158_v11 = vor.u32 %v1406_v8, %v1157_v7  ;;  %v1149_v13 = vld [vmem:[%s1947_s1 + $0x80] sm:$0xf] }
  0x25   :  { %184 = vmatpush.bf16.msra.mxu1 %v1010_v29  ;;  %308 = vmatpush.bf16.msra.mxu3 %v1098_v38  ;;  %v1162_v12 = vor.u32 %v1405_v9, %v1159_v10  ;;  %v1404_v14 = vld [vmem:[%s1947_s1 + $0x84] sm:$0xf0]  ;;  %v1403_v15 = vld [vmem:[%s1947_s1 + $0x84] sm:$0xf]  ;;  %v1151_v16 = vld [vmem:[%s1947_s1 + $0x88] sm:$0xf0] }
  0x26   :  { %v1150_v17 = vor.u32 %v1404_v14, %v1149_v13  ;;  %v1154_v18 = vor.u32 %v1403_v15, %v1151_v16  ;;  %v1474_v19 = vld [vmem:[#allocation3 + $0x38] sm:$0xff]  ;;  %v1473_v21 = vld [vmem:[#allocation3 + $0x30] sm:$0xff]  ;;  %v1472_v24 = vld [vmem:[#allocation3 + $0x28] sm:$0xff] }
  0x27   :  { %171 = vmatmul.bf16.vlgmr.msra.gmra.mxu0 %v1786_v37  ;;  %v1482_v20 = vld [vmem:[#allocation3 + $0x78] sm:$0xff]  ;;  %v1481_v23 = vld [vmem:[#allocation3 + $0x70] sm:$0xff]  ;;  %v1480_v25 = vld [vmem:[#allocation3 + $0x68] sm:$0xff] }
  0x28   :  { %430 = vmatpush.bf16.msrb.mxu0 %v1206_v30  ;;  %185 = vmatmul.bf16.vlgmr.msra.gmra.mxu1 %v1786_v37  ;;  %v1490_v27 = vld [vmem:[#allocation3 + $0x138] sm:$0xff]  ;;  %v1471_v28 = vld [vmem:[#allocation3 + $0x20] sm:$0xff]  ;;  %v1497_v34 = vld [vmem:[#allocation3 + $0x170] sm:$0xff] }
  0x29   :  { %444 = vmatpush.bf16.msrb.mxu1 %v1210_v31  ;;  %295 = vmatpush.bf16.msra.mxu2 %v1086_v47  ;;  %v1479_v29 = vld [vmem:[#allocation3 + $0x60] sm:$0xff]  ;;  %v1498_v30 = vld [vmem:[#allocation3 + $0x178] sm:$0xff]  ;;  %v1489_v31 = vld [vmem:[#allocation3 + $0x130] sm:$0xff] }
  0x2a   :  { %309 = vmatpush.bf16.msra.mxu3 %v1090_v50  ;;  %v1470_v32 = vld [vmem:[#allocation3 + $0x18] sm:$0xff]  ;;  %v1488_v35 = vld [vmem:[#allocation3 + $0x128] sm:$0xff]  ;;  %v1477_v38 = vld [vmem:[#allocation3 + $0x50] sm:$0xff] }
  0x2b   :  { %v1478_v33 = vld [vmem:[#allocation3 + $0x58] sm:$0xff]  ;;  %v1496_v36 = vld [vmem:[#allocation3 + $0x168] sm:$0xff]  ;;  %v1487_v41 = vld [vmem:[#allocation3 + $0x120] sm:$0xff] }
  0x2c   :  { %431 = vmatpush.bf16.msrb.mxu0 %v1198_v43  ;;  %296 = vmatmul.bf16.vlgmr.msra.gmra.mxu2 %v1786_v37  ;;  %v1468_v39 = vld [vmem:[#allocation3 + $0x8] sm:$0xff]  ;;  %v1495_v42 = vld [vmem:[#allocation3 + $0x160] sm:$0xff]  ;;  %v1486_v45 = vld [vmem:[#allocation3 + $0x118] sm:$0xff] }
  0x2d   :  { %445 = vmatpush.bf16.msrb.mxu1 %v1202_v44  ;;  %310 = vmatmul.bf16.vlgmr.msra.gmra.mxu3 %v1786_v37  ;;  %v1476_v40 = vld [vmem:[#allocation3 + $0x48] sm:$0xff]  ;;  %v1467_v43 = vld [vmem:[#allocation3] sm:$0xff]  ;;  %v1494_v46 = vld [vmem:[#allocation3 + $0x158] sm:$0xff] }
  0x2e   :  { %649 = vmatpush.bf16.msrb.mxu2 %v1474_v19  ;;  %663 = vmatpush.bf16.msrb.mxu3 %v1482_v20  ;;  %v1475_v44 = vld [vmem:[#allocation3 + $0x40] sm:$0xff]  ;;  %v1458_v47 = vld [vmem:[#allocation3 + $0xb8] sm:$0xff]  ;;  %v1485_v49 = vld [vmem:[#allocation3 + $0x110] sm:$0xff] }
  0x2f   :  { %v1466_v48 = vld [vmem:[#allocation3 + $0xf8] sm:$0xff]  ;;  %v1493_v50 = vld [vmem:[#allocation3 + $0x150] sm:$0xff]  ;;  %v1484_v54 = vld [vmem:[#allocation3 + $0x108] sm:$0xff] }
  0x30   :  { %432 = vmatpush.bf16.msrb.mxu0 %v1190_v51  ;;  %v1457_v51 = vld [vmem:[#allocation3 + $0xb0] sm:$0xff]  ;;  %v1492_v55 = vld [vmem:[#allocation3 + $0x148] sm:$0xff]  ;;  %v1483_v59 = vld [vmem:[#allocation3 + $0x100] sm:$0xff] }
  0x31   :  { %446 = vmatpush.bf16.msrb.mxu1 %v1194_v52  ;;  %v1465_v52 = vld [vmem:[#allocation3 + $0xf0] sm:$0xff]  ;;  %v1456_v56 = vld [vmem:[#allocation3 + $0xa8] sm:$0xff]  ;;  %v1491_v60 = vld [vmem:[#allocation3 + $0x140] sm:$0xff] }
  0x32   :  { %650 = vmatpush.bf16.msrb.mxu2 %v1473_v21  ;;  %664 = vmatpush.bf16.msrb.mxu3 %v1481_v23  ;;  %v1455_v61 = vld [vmem:[#allocation3 + $0xa0] sm:$0xff]  ;;  %v1454_v2 = vld [vmem:[#allocation3 + $0x98] sm:$0xff]  ;;  %v1453_v7 = vld [vmem:[#allocation3 + $0x90] sm:$0xff] }
  0x33   :  { %v1462_v3 = vld [vmem:[#allocation3 + $0xd8] sm:$0xff]  ;;  %v1461_v8 = vld [vmem:[#allocation3 + $0xd0] sm:$0xff]  ;;  %v1452_v14 = vld [vmem:[#allocation3 + $0x88] sm:$0xff] }
  0x34   :  { %433 = vmatpush.bf16.msrb.mxu0 %v1182_v57  ;;  %v1460_v15 = vld [vmem:[#allocation3 + $0xc8] sm:$0xff] }
  0x35   :  { %447 = vmatpush.bf16.msrb.mxu1 %v1186_v58  ;;  %v1464_v58 = vld [vmem:[#allocation3 + $0xe8] sm:$0xff] }
  0x36   :  { %651 = vmatpush.bf16.msrb.mxu2 %v1472_v24  ;;  %665 = vmatpush.bf16.msrb.mxu3 %v1480_v25  ;;  %v1451_v24 = vld [vmem:[#allocation3 + $0x80] sm:$0xff] }
  0x37   :  { %v1459_v25 = vld [vmem:[#allocation3 + $0xc0] sm:$0xff] }
  0x38   :  { %434 = vmatpush.bf16.msrb.mxu0 %v1174_v63  ;;  %v1463_v63 = vld [vmem:[#allocation3 + $0xe0] sm:$0xff] }
  0x39   :  { %448 = vmatpush.bf16.msrb.mxu1 %v1178_v0 }
  0x3a   :  { %652 = vmatpush.bf16.msrb.mxu2 %v1471_v28  ;;  %666 = vmatpush.bf16.msrb.mxu3 %v1479_v29 }
  0x3c   :  { %435 = vmatpush.bf16.msrb.mxu0 %v1166_v5  ;;  %v1882_v5 = vshrl.u32 %v42_v1, 7 }
  0x3d   :  { %449 = vmatpush.bf16.msrb.mxu1 %v1170_v6 }
  0x3e   :  { %653 = vmatpush.bf16.msrb.mxu2 %v1470_v32  ;;  %667 = vmatpush.bf16.msrb.mxu3 %v1478_v33  ;;  %vm320_vm0 = vcmp.lt.s32.totalorder %v1882_v5, 1  ;;  %vm45_vm1 = vcmp.eq.s32.totalorder %v1882_v5, 0  ;;  %vm337_vm2 = vcmp.lt.s32.totalorder %v1882_v5, 7  ;;  %v462_v33 = vld [vmem:[%s1948_s2] sm:$0x3] }
  0x40   :  { %436 = vmatpush.bf16.msrb.mxu0 %v1158_v11 }
  0x41   :  { %450 = vmatpush.bf16.msrb.mxu1 %v1162_v12 }
  0x42   :  { %668 = vmatpush.bf16.msrb.mxu3 %v1477_v38  ;;  %v464_v38 = vperm.slane %v462_v33, 0 }
  0x44   :  { %437 = vmatpush.bf16.msrb.mxu0 %v1150_v17 }
  0x45   :  { %451 = vmatpush.bf16.msrb.mxu1 %v1154_v18 }
  0x46   :  { %669 = vmatpush.bf16.msrb.mxu3 %v1476_v40  ;;  %v465_v40 = vperm.slane %v462_v33, 1 }
  0x47   :  { %438 = vmatmul.bf16.vlgmr.msrb.gmra.mxu0 %v1786_v37 }
  0x48   :  { %452 = vmatmul.bf16.vlgmr.msrb.gmra.mxu1 %v1786_v37  ;;  %806 = vmatpush.bf16.msra.mxu0 %v1490_v27  ;;  %v1469_v37 = vld [vmem:[#allocation3 + $0x10] sm:$0xff] }
  0x49   :  { %820 = vmatpush.bf16.msra.mxu1 %v1498_v30  ;;  %654 = vmatpush.bf16.msrb.mxu2 %v1469_v37 }
  0x4a   :  { %670 = vmatpush.bf16.msrb.mxu3 %v1475_v44 }
  0x4c   :  { %807 = vmatpush.bf16.msra.mxu0 %v1489_v31 }
  0x4d   :  { %821 = vmatpush.bf16.msra.mxu1 %v1497_v34  ;;  %655 = vmatpush.bf16.msrb.mxu2 %v1468_v39 }
  0x4e   :  { %956 = vmatpush.bf16.msra.mxu3 %v1466_v48 }
  0x50   :  { %808 = vmatpush.bf16.msra.mxu0 %v1488_v35 }
  0x51   :  { %822 = vmatpush.bf16.msra.mxu1 %v1496_v36  ;;  %656 = vmatpush.bf16.msrb.mxu2 %v1467_v43  ;;  %v1905_v36 = vadd.s32 8, %v1882_v5 }
  0x52   :  { %957 = vmatpush.bf16.msra.mxu3 %v1465_v52 }
  0x53   :  { %vm48_vm3 = vcmp.eq.s32.totalorder %v1905_v36, 15 }
  0x54   :  { %809 = vmatpush.bf16.msra.mxu0 %v1487_v41 }
  0x55   :  { %823 = vmatpush.bf16.msra.mxu1 %v1495_v42  ;;  %942 = vmatpush.bf16.msra.mxu2 %v1458_v47 }
  0x56   :  { %958 = vmatpush.bf16.msra.mxu3 %v1464_v58 }
  0x58   :  { %810 = vmatpush.bf16.msra.mxu0 %v1486_v45 }
  0x59   :  { %824 = vmatpush.bf16.msra.mxu1 %v1494_v46  ;;  %943 = vmatpush.bf16.msra.mxu2 %v1457_v51 }
  0x5a   :  { %959 = vmatpush.bf16.msra.mxu3 %v1463_v63 }
  0x5c   :  { %811 = vmatpush.bf16.msra.mxu0 %v1485_v49  ;;  %v477_v49 = vstv %s1949_s3 }
  0x5d   :  { %825 = vmatpush.bf16.msra.mxu1 %v1493_v50  ;;  %944 = vmatpush.bf16.msra.mxu2 %v1456_v56 }
  0x5e   :  { %960 = vmatpush.bf16.msra.mxu3 %v1462_v3 }
  0x60   :  { %812 = vmatpush.bf16.msra.mxu0 %v1484_v54 }
  0x61   :  { %826 = vmatpush.bf16.msra.mxu1 %v1492_v55  ;;  %945 = vmatpush.bf16.msra.mxu2 %v1455_v61 }
  0x62   :  { %961 = vmatpush.bf16.msra.mxu3 %v1461_v8 }
  0x64   :  { %813 = vmatpush.bf16.msra.mxu0 %v1483_v59 }
  0x65   :  { %827 = vmatpush.bf16.msra.mxu1 %v1491_v60  ;;  %946 = vmatpush.bf16.msra.mxu2 %v1454_v2 }
  0x66   :  { %962 = vmatpush.bf16.msra.mxu3 %v1460_v15 }
  0x69   :  { %947 = vmatpush.bf16.msra.mxu2 %v1453_v7 }
  0x6a   :  { %963 = vmatpush.bf16.msra.mxu3 %v1459_v25 }
  0x6d   :  { %948 = vmatpush.bf16.msra.mxu2 %v1452_v14 }
  0x71   :  { %949 = vmatpush.bf16.msra.mxu2 %v1451_v24 }
  0xa4   :  { %v1878_v53 = vpop.f32.mrf.mxu0 }
  0xa5   :  { %v1880_v57 = vpop.f32.mrf.mxu1  ;;  %v316_v9 = vrot.slane %v1878_v53, 7 }
  0xa6   :  { %v317_v11 = vrot.slane %v1880_v57, 7 }
  0xac   :  { %v174_v4 = vpop.f32.mrf.mxu0 }
  0xad   :  { %v188_v6 = vpop.f32.mrf.mxu1  ;;  %v318_v10 = vrot.slane %v174_v4, 7 }
  0xae   :  { %v319_v12 = vrot.slane %v188_v6, 7 }
  0xaf   :  { %v297_v62 = vpop.f32.mrf.mxu2  ;;  %v323_v17 = vsel %vm320_vm0, %v318_v10, %v316_v9  ;;  %v321_v42 = vsel %vm320_vm0, %v316_v9, %v318_v10 }
  0xb0   :  { %v311_v0 = vpop.f32.mrf.mxu3  ;;  %v333_v18 = vrot.slane %v297_v62, 1  ;;  %v324_v20 = vsel %vm320_vm0, %v319_v12, %v317_v11  ;;  %v329_v27 = vsel %vm45_vm1, 0.0, %v323_v17  ;;  %v322_v47 = vsel %vm320_vm0, %v317_v11, %v319_v12 }
  0xb1   :  { %v334_v21 = vrot.slane %v311_v0, 1  ;;  %v330_v30 = vsel %vm45_vm1, 0.0, %v324_v20 }
  0xb7   :  { %v299_v13 = vpop.f32.mrf.mxu2 }
  0xb8   :  { %v313_v16 = vpop.f32.mrf.mxu3  ;;  %v335_v19 = vrot.slane %v299_v13, 1 }
  0xb9   :  { %v336_v23 = vrot.slane %v313_v16, 1 }
  0xba   :  { %v338_v32 = vsel %vm337_vm2, %v333_v18, %v335_v19  ;;  %v340_v41 = vsel %vm337_vm2, %v335_v19, %v333_v18 }
  0xbb   :  { %v339_v35 = vsel %vm337_vm2, %v334_v21, %v336_v23  ;;  %v341_v44 = vsel %vm337_vm2, %v336_v23, %v334_v21  ;;  %v348_v51 = vsel %vm48_vm3, 0.0, %v340_v41 }
  0xbc   :  { %v349_v54 = vsel %vm48_vm3, 0.0, %v341_v44 }
  0xc4   :  { %v439_v28 = vpop.f32.mrf.mxu0 }
  0xc5   :  { %v440_v29 = vadd.f32 %v439_v28, %v329_v27  ;;  %v453_v31 = vpop.f32.mrf.mxu1 }
  0xc6   :  { %v454_v34 = vadd.f32 %v453_v31, %v330_v30 }
  0xc7   :  { %v458_v37 = vadd.f32 %v440_v29, %v338_v32  ;;  %v1502_v29 = vld [vmem:[%s1951_s5] ss:$0 sm:$0xff] }
  0xc8   :  { %v459_v39 = vadd.f32 %v454_v34, %v339_v35 }
  0xc9   :  { %v468_v45 = vadd.f32 %v464_v38, %v458_v37 }
  0xca   :  { %v469_v50 = vadd.f32 %v465_v40, %v459_v39 }
  0xcb   :  { %v478_v56 = vmul.f32 %v477_v49, %v468_v45  ;;  %vm473_vm4 = vcmp.ge.f32.partialorder %v468_v45, 0.0 }
  0xcc   :  { %v441_v43 = vpop.f32.mrf.mxu0  ;;  %v479_v58 = vmul.f32 %v477_v49, %v469_v50  ;;  %vm474_vm6 = vcmp.ge.f32.partialorder %v469_v50, 0.0 }
  0xcd   :  { %v442_v46 = vadd.f32 %v441_v43, %v321_v42  ;;  %v455_v48 = vpop.f32.mrf.mxu1  ;;  %v482_v62 = vsel %vm473_vm4, %v468_v45, %v478_v56 }
  0xce   :  { %v456_v52 = vadd.f32 %v455_v48, %v322_v47  ;;  %v483_v1 = vsel %vm474_vm6, %v469_v50, %v479_v58 }
  0xcf   :  { %v460_v53 = vadd.f32 %v442_v46, %v348_v51 }
  0xd0   :  { %v461_v55 = vadd.f32 %v456_v52, %v349_v54 }
  0xd1   :  { %v470_v57 = vadd.f32 %v464_v38, %v460_v53 }
  0xd2   :  { %v471_v59 = vadd.f32 %v465_v40, %v461_v55 }
  0xd3   :  { %v480_v60 = vmul.f32 %v477_v49, %v470_v57  ;;  %vm475_vm5 = vcmp.ge.f32.partialorder %v470_v57, 0.0 }
  0xd4   :  { %v481_v61 = vmul.f32 %v477_v49, %v471_v59  ;;  %vm476_vm7 = vcmp.ge.f32.partialorder %v471_v59, 0.0 }
  0xd5   :  { %v484_v63 = vsel %vm475_vm5, %v470_v57, %v480_v60 }
  0xd6   :  { %v486_v0 = vpack.c.bf16 %v484_v63, %v482_v62  ;;  %v485_v2 = vsel %vm476_vm7, %v471_v59, %v481_v61 }
  0xd7   :  { %v487_v3 = vpack.c.bf16 %v485_v2, %v483_v1 }
  0xd8   :  { %657 = vmatmul.bf16.vlgmr.msrb.gmra.mxu2 %v486_v0  ;;  %814 = vmatmul.bf16.vlgmr.msra.gmra.mxu0 %v486_v0 }
  0xd9   :  { %671 = vmatmul.bf16.vlgmr.msrb.gmra.mxu3 %v487_v3  ;;  %828 = vmatmul.bf16.vlgmr.msra.gmra.mxu1 %v487_v3 }
  0xe8   :  { %950 = vmatmul.bf16.vlgmr.msra.gmra.mxu2 %v486_v0 }
  0xe9   :  { %964 = vmatmul.bf16.vlgmr.msra.gmra.mxu3 %v487_v3 }
 0x155   :  { %v815_v4 = vpop.f32.mrf.mxu0 }
 0x156   :  { %v829_v6 = vpop.f32.mrf.mxu1 }
 0x157   :  { %v830_v18 = vadd.f32 %v829_v6, %v815_v4 }
 0x159   :  { %v840_v27 = vrot.slane %v830_v18, 1 }
 0x15b   :  { %v658_v7 = vpop.f32.mrf.mxu2 }
 0x15c   :  { %v672_v8 = vpop.f32.mrf.mxu3 }
 0x15d   :  { %v673_v9 = vadd.f32 %v672_v8, %v658_v7  ;;  %v817_v10 = vpop.f32.mrf.mxu0 }
 0x15e   :  { %v831_v12 = vpop.f32.mrf.mxu1 }
 0x15f   :  { %v834_v15 = vrot.slane %v673_v9, 7  ;;  %v832_v16 = vadd.f32 %v831_v12, %v817_v10 }
 0x161   :  { %v841_v20 = vrot.slane %v832_v16, 1 }
 0x163   :  { %v660_v11 = vpop.f32.mrf.mxu2  ;;  %v842_v30 = vsel %vm337_vm2, %v840_v27, %v841_v20  ;;  %v843_v38 = vsel %vm337_vm2, %v841_v20, %v840_v27 }
 0x164   :  { %v674_v13 = vpop.f32.mrf.mxu3  ;;  %v845_v41 = vsel %vm48_vm3, 0.0, %v843_v38 }
 0x165   :  { %v675_v14 = vadd.f32 %v674_v13, %v660_v11 }
 0x167   :  { %v835_v17 = vrot.slane %v675_v14, 7 }
 0x169   :  { %v837_v19 = vsel %vm320_vm0, %v835_v17, %v834_v15  ;;  %v836_v33 = vsel %vm320_vm0, %v834_v15, %v835_v17 }
 0x16a   :  { %v838_v21 = vsel %vm45_vm1, 0.0, %v837_v19 }
 0x16b   :  { %v951_v23 = vpop.f32.mrf.mxu2 }
 0x16c   :  { %v952_v24 = vadd.f32 %v951_v23, %v838_v21  ;;  %v965_v25 = vpop.f32.mrf.mxu3 }
 0x16e   :  { %v966_v28 = vadd.f32 %v965_v25, %v952_v24 }
 0x170   :  { %v970_v31 = vadd.f32 %v966_v28, %v842_v30 }
 0x172   :  { %v976_v32 = vadd.f32 %v1502_v29, %v970_v31 }
 0x173   :  { %v953_v34 = vpop.f32.mrf.mxu2 }
 0x174   :  { %v978_v35 = vadd.f32 %v976_v32, %v1753_v22  ;;  %v954_v37 = vadd.f32 %v953_v34, %v836_v33  ;;  %v967_v39 = vpop.f32.mrf.mxu3 }
 0x176   :  { %980 = vst [vmem:[%s1952_s6] sm:$0xff] %v978_v35  ;;  %v968_v40 = vadd.f32 %v967_v39, %v954_v37 }
 0x178   :  { %v971_v42 = vadd.f32 %v968_v40, %v845_v41 }
 0x17a   :  { %v977_v43 = vadd.f32 %v1502_v29, %v971_v42 }
 0x17c   :  { %v979_v44 = vadd.f32 %v977_v43, %v1764_v26 }
 0x17e   :  { %981 = vst [vmem:[%s1952_s6 + $0x8] sm:$0xff] %v979_v44 }
 0x17f   :  { %986 = vsyncpa [#allocation4], 1 }

</bundles_post_ra>
